<compile_context>
chip_gen: v6e
topology: v6e:2x2x1
jax: 0.10.0
libtpu: 0.0.40
codegen_flags: <defaults>
</compile_context>

<pallas_src>
import functools

import jax
import jax.numpy as jnp
from jax.experimental import pallas as pl
from jax.experimental.pallas import tpu as pltpu


def _round_up(x, m):
    return ((x + m - 1) // m) * m


def _wlp_kernel(w_ref, x_ref, o_ref, *, num_layers):
    """Weighted sum over layers; layer axis lives inside the block.

    w_ref: (L,) f32 in SMEM, pre-scaled by 1/sum(layer_weights)
    x_ref: (L, TR, H) VMEM tile (all selected layers for this row tile)
    o_ref: (TR, H) output tile, written exactly once
    """
    acc = w_ref[0] * x_ref[0].astype(jnp.float32)
    for l in range(1, num_layers):           # static unroll; L is small (~9)
        acc += w_ref[l] * x_ref[l].astype(jnp.float32)
    o_ref[...] = acc.astype(o_ref.dtype)


def _vmem_budget():
    """Per-generation (live VMEM budget, scoped vmem limit) in bytes."""
    try:
        cap = pltpu.get_tpu_info().vmem_capacity_bytes
    except Exception:
        cap = 64 * 1024 * 1024               # unknown -> be v7x-safe
    if cap >= 100 * 1024 * 1024:             # v5e / v6e: 128 MiB physical VMEM
        return 80 * 1024 * 1024, 104 * 1024 * 1024
    # v7x: 64 MiB per TensorCore, 32 MiB scoped default
    return 40 * 1024 * 1024, 52 * 1024 * 1024


def _choose_row_tile(rows, num_layers, hidden, in_itemsize, out_itemsize,
                     live_budget):
    """Row-tile size: multiple of the dtype sublane count, live VMEM <= budget,
    and >= 2 tiles when rows allow it (feeds both v7x TensorCores)."""
    # Sublane packing: f32 -> 8, bf16 -> 16, int8/fp8 -> 32.
    sub = max(8, 32 // max(1, in_itemsize))
    # Live bytes per row per grid step: double-buffered (L, tr, H) input,
    # double-buffered (tr, H) output, plus ~one f32 row of accumulator temps.
    bytes_per_row = hidden * (2 * num_layers * in_itemsize + 2 * out_itemsize + 4)
    max_rows = max(sub, int(live_budget // bytes_per_row) // sub * sub)
    if rows <= 2 * sub:
        return rows                          # too small to split; full-extent block
    # Cap at ~rows/2 so the parallel axis has at least two tiles (v7x megacore).
    two_tc_cap = _round_up(pl.cdiv(rows, 2), sub)
    tr = min(max_rows, two_tc_cap)
    if tr >= rows:
        return rows
    return max(sub, (tr // sub) * sub)


def weighted_layer_pooling(all_hidden_states, layer_weights, layer_start):
    """all_hidden_states: (num_layers+1, B, S, H); layer_weights: (L,) with
    L = num_layers+1-layer_start.  Returns (B, S, H) in the input dtype."""
    x = all_hidden_states[layer_start:]      # static slice of layers
    L, B, S, H = x.shape
    assert layer_weights.shape == (L,)

    rows = B * S
    x2 = x.reshape(L, rows, H)               # lane-dense last dim = H

    # Fold the normalization into the tiny weight vector (exactly equivalent
    # to (w * x).sum(0) / w.sum() in the PyTorch module).
    w = layer_weights.astype(jnp.float32)
    w = w / w.sum()

    live_budget, vmem_limit = _vmem_budget()
    tr = _choose_row_tile(
        rows, L, H,
        jnp.dtype(x2.dtype).itemsize,
        jnp.dtype(all_hidden_states.dtype).itemsize,
        live_budget,
    )
    n_row_tiles = pl.cdiv(rows, tr)

    kernel = functools.partial(_wlp_kernel, num_layers=L)

    out = pl.pallas_call(
        kernel,
        out_shape=jax.ShapeDtypeStruct((rows, H), all_hidden_states.dtype),
        grid=(n_row_tiles,),
        in_specs=[
            pl.BlockSpec(memory_space=pltpu.SMEM),             # weights (L,)
            pl.BlockSpec((L, tr, H), lambda r: (0, r, 0)),     # all layers, row tile
        ],
        out_specs=pl.BlockSpec((tr, H), lambda r: (r, 0)),
        compiler_params=pltpu.CompilerParams(
            dimension_semantics=("parallel",),
            vmem_limit_bytes=vmem_limit,
        ),
    )(w, x2)
    return out.reshape(B, S, H)


if __name__ == "__main__":
    # Module config (matches nn.Module __init__ semantics)
    num_hidden_layers = 12
    layer_start = 4
    num_selected = num_hidden_layers + 1 - layer_start  # 9

    # Default parameter init: ones (as in the PyTorch module).
    layer_weights = jnp.ones((num_selected,), dtype=jnp.float32)

    # Small deterministic input: (num_layers+1, batch, seq, hidden), lane-dense H.
    B, S, H = 2, 8, 128
    key = jax.random.PRNGKey(0)
    all_hidden_states = jax.random.normal(
        key, (num_hidden_layers + 1, B, S, H), dtype=jnp.float32
    )

    # --- f32 run (tight check) ---
    out = weighted_layer_pooling(all_hidden_states, layer_weights, layer_start)
    out = jax.block_until_ready(out)

    sel = all_hidden_states[layer_start:]
    ref = (layer_weights[:, None, None, None] * sel).sum(axis=0) / layer_weights.sum()

    assert out.shape == (B, S, H), out.shape
    assert jnp.allclose(out, ref, atol=1e-5, rtol=1e-5), float(
        jnp.max(jnp.abs(out - ref))
    )

    # --- bf16 run (bandwidth-friendly path; f32 accumulation inside the kernel) ---
    ahs_bf16 = all_hidden_states.astype(jnp.bfloat16)
    out_bf16 = weighted_layer_pooling(ahs_bf16, layer_weights, layer_start)
    out_bf16 = jax.block_until_ready(out_bf16)

    sel_bf16 = ahs_bf16[layer_start:].astype(jnp.float32)
    ref_bf16 = (layer_weights[:, None, None, None] * sel_bf16).sum(
        axis=0
    ) / layer_weights.sum()
    assert out_bf16.shape == (B, S, H), out_bf16.shape
    assert jnp.allclose(
        out_bf16.astype(jnp.float32), ref_bf16, atol=1e-2, rtol=1e-2
    ), float(jnp.max(jnp.abs(out_bf16.astype(jnp.float32) - ref_bf16)))

    print("KERNEL_OK")
</pallas_src>

<mosaic_0001>
module attributes {stable_mosaic.version = 11 : i64} {
  func.func @_wlp_kernel(%arg0: i32, %arg1: memref<9xf32, #tpu.memory_space<smem>>, %arg2: memref<9x16x128xf32, #tpu.memory_space<vmem>>, %arg3: memref<16x128xf32, #tpu.memory_space<vmem>>) attributes {dimension_semantics = [#tpu.dimension_semantics<parallel>], iteration_bounds = array<i64: 1>, scalar_prefetch = 0 : i64, scratch_operands = 0 : i64, tpu.core_type = #tpu.core_type<tc>, window_params = [{transform_indices = @transform_0, window_bounds = array<i64: 9>}, {transform_indices = @transform_1, window_bounds = array<i64: 9, 16, 128>}, {transform_indices = @transform_2, window_bounds = array<i64: 16, 128>}]} {
    %c0 = arith.constant 0 : index
    %0 = memref.load %arg1[%c0] : memref<9xf32, #tpu.memory_space<smem>>
    %c0_0 = arith.constant 0 : index
    %c0_1 = arith.constant 0 : index
    %c0_2 = arith.constant 0 : index
    %1 = vector.load %arg2[%c0_0, %c0_1, %c0_2] : memref<9x16x128xf32, #tpu.memory_space<vmem>>, vector<1x16x128xf32>
    %2 = vector.shape_cast %1 : vector<1x16x128xf32> to vector<16x128xf32>
    %3 = vector.broadcast %0 : f32 to vector<16x128xf32>
    %4 = arith.mulf %3, %2 : vector<16x128xf32>
    %c1 = arith.constant 1 : index
    %5 = memref.load %arg1[%c1] : memref<9xf32, #tpu.memory_space<smem>>
    %c1_3 = arith.constant 1 : index
    %c0_4 = arith.constant 0 : index
    %c0_5 = arith.constant 0 : index
    %6 = vector.load %arg2[%c1_3, %c0_4, %c0_5] : memref<9x16x128xf32, #tpu.memory_space<vmem>>, vector<1x16x128xf32>
    %7 = vector.shape_cast %6 : vector<1x16x128xf32> to vector<16x128xf32>
    %8 = vector.broadcast %5 : f32 to vector<16x128xf32>
    %9 = arith.mulf %8, %7 : vector<16x128xf32>
    %10 = arith.addf %4, %9 : vector<16x128xf32>
    %c2 = arith.constant 2 : index
    %11 = memref.load %arg1[%c2] : memref<9xf32, #tpu.memory_space<smem>>
    %c2_6 = arith.constant 2 : index
    %c0_7 = arith.constant 0 : index
    %c0_8 = arith.constant 0 : index
    %12 = vector.load %arg2[%c2_6, %c0_7, %c0_8] : memref<9x16x128xf32, #tpu.memory_space<vmem>>, vector<1x16x128xf32>
    %13 = vector.shape_cast %12 : vector<1x16x128xf32> to vector<16x128xf32>
    %14 = vector.broadcast %11 : f32 to vector<16x128xf32>
    %15 = arith.mulf %14, %13 : vector<16x128xf32>
    %16 = arith.addf %10, %15 : vector<16x128xf32>
    %c3 = arith.constant 3 : index
    %17 = memref.load %arg1[%c3] : memref<9xf32, #tpu.memory_space<smem>>
    %c3_9 = arith.constant 3 : index
    %c0_10 = arith.constant 0 : index
    %c0_11 = arith.constant 0 : index
    %18 = vector.load %arg2[%c3_9, %c0_10, %c0_11] : memref<9x16x128xf32, #tpu.memory_space<vmem>>, vector<1x16x128xf32>
    %19 = vector.shape_cast %18 : vector<1x16x128xf32> to vector<16x128xf32>
    %20 = vector.broadcast %17 : f32 to vector<16x128xf32>
    %21 = arith.mulf %20, %19 : vector<16x128xf32>
    %22 = arith.addf %16, %21 : vector<16x128xf32>
    %c4 = arith.constant 4 : index
    %23 = memref.load %arg1[%c4] : memref<9xf32, #tpu.memory_space<smem>>
    %c4_12 = arith.constant 4 : index
    %c0_13 = arith.constant 0 : index
    %c0_14 = arith.constant 0 : index
    %24 = vector.load %arg2[%c4_12, %c0_13, %c0_14] : memref<9x16x128xf32, #tpu.memory_space<vmem>>, vector<1x16x128xf32>
    %25 = vector.shape_cast %24 : vector<1x16x128xf32> to vector<16x128xf32>
    %26 = vector.broadcast %23 : f32 to vector<16x128xf32>
    %27 = arith.mulf %26, %25 : vector<16x128xf32>
    %28 = arith.addf %22, %27 : vector<16x128xf32>
    %c5 = arith.constant 5 : index
    %29 = memref.load %arg1[%c5] : memref<9xf32, #tpu.memory_space<smem>>
    %c5_15 = arith.constant 5 : index
    %c0_16 = arith.constant 0 : index
    %c0_17 = arith.constant 0 : index
    %30 = vector.load %arg2[%c5_15, %c0_16, %c0_17] : memref<9x16x128xf32, #tpu.memory_space<vmem>>, vector<1x16x128xf32>
    %31 = vector.shape_cast %30 : vector<1x16x128xf32> to vector<16x128xf32>
    %32 = vector.broadcast %29 : f32 to vector<16x128xf32>
    %33 = arith.mulf %32, %31 : vector<16x128xf32>
    %34 = arith.addf %28, %33 : vector<16x128xf32>
    %c6 = arith.constant 6 : index
    %35 = memref.load %arg1[%c6] : memref<9xf32, #tpu.memory_space<smem>>
    %c6_18 = arith.constant 6 : index
    %c0_19 = arith.constant 0 : index
    %c0_20 = arith.constant 0 : index
    %36 = vector.load %arg2[%c6_18, %c0_19, %c0_20] : memref<9x16x128xf32, #tpu.memory_space<vmem>>, vector<1x16x128xf32>
    %37 = vector.shape_cast %36 : vector<1x16x128xf32> to vector<16x128xf32>
    %38 = vector.broadcast %35 : f32 to vector<16x128xf32>
    %39 = arith.mulf %38, %37 : vector<16x128xf32>
    %40 = arith.addf %34, %39 : vector<16x128xf32>
    %c7 = arith.constant 7 : index
    %41 = memref.load %arg1[%c7] : memref<9xf32, #tpu.memory_space<smem>>
    %c7_21 = arith.constant 7 : index
    %c0_22 = arith.constant 0 : index
    %c0_23 = arith.constant 0 : index
    %42 = vector.load %arg2[%c7_21, %c0_22, %c0_23] : memref<9x16x128xf32, #tpu.memory_space<vmem>>, vector<1x16x128xf32>
    %43 = vector.shape_cast %42 : vector<1x16x128xf32> to vector<16x128xf32>
    %44 = vector.broadcast %41 : f32 to vector<16x128xf32>
    %45 = arith.mulf %44, %43 : vector<16x128xf32>
    %46 = arith.addf %40, %45 : vector<16x128xf32>
    %c8 = arith.constant 8 : index
    %47 = memref.load %arg1[%c8] : memref<9xf32, #tpu.memory_space<smem>>
    %c8_24 = arith.constant 8 : index
    %c0_25 = arith.constant 0 : index
    %c0_26 = arith.constant 0 : index
    %48 = vector.load %arg2[%c8_24, %c0_25, %c0_26] : memref<9x16x128xf32, #tpu.memory_space<vmem>>, vector<1x16x128xf32>
    %49 = vector.shape_cast %48 : vector<1x16x128xf32> to vector<16x128xf32>
    %50 = vector.broadcast %47 : f32 to vector<16x128xf32>
    %51 = arith.mulf %50, %49 : vector<16x128xf32>
    %52 = arith.addf %46, %51 : vector<16x128xf32>
    %c0_27 = arith.constant 0 : index
    %c0_28 = arith.constant 0 : index
    %53 = vector.load %arg3[%c0_27, %c0_28] : memref<16x128xf32, #tpu.memory_space<vmem>>, vector<16x128xf32>
    tpu.vector_store %arg3[%c0_27, %c0_28], %52 {strides = array<i32>} : memref<16x128xf32, #tpu.memory_space<vmem>>, vector<16x128xf32>,
    return
  }
  func.func @transform_0(%arg0: i32) -> i32 {
    %c0_i32 = arith.constant 0 : i32
    %c0_i32_0 = arith.constant 0 : i32
    return %c0_i32 : i32
  }
  func.func @transform_1(%arg0: i32) -> (i32, i32, i32) {
    %c0_i32 = arith.constant 0 : i32
    %c0_i32_0 = arith.constant 0 : i32
    %c0_i32_1 = arith.constant 0 : i32
    return %c0_i32, %arg0, %c0_i32_0 : i32, i32, i32
  }
  func.func @transform_2(%arg0: i32) -> (i32, i32) {
    %c0_i32 = arith.constant 0 : i32
    %c0_i32_0 = arith.constant 0 : i32
    return %arg0, %c0_i32 : i32, i32
  }
}

</mosaic_0001>

<bundles_post_ra>
// kernel: tpu_custom_call.1
= control target key start
LH: loop header
LB: loop body
LE: loop exit
PB: predicated region body
PF: predicated region fallthrough
CT: control target
= control target key end

     0   :  { %7 = vsyncpa [#allocation5], 0  ;;  %s255_s0 = inlined_call_operand.hbm [shape: f32[9], index: 0, kind: input, shape index: {}]   ;;  %s256_s1 = inlined_call_operand.hbm [shape: f32[9,16,128], index: 1, kind: input, shape index: {}]   ;;  %s257_s2 = inlined_call_operand.hbm [shape: f32[16,128], index: 2, kind: output, shape index: {}]  }
   0x1   :  { %8 = vsyncpa [#allocation3], 0 }
   0x2   :  { %9 = vsyncpa [#allocation4], 0  ;;  %s202_s9 = smov [#allocation2]   ;;  %s203_s12 = smov [#allocation6]  }
   0x3   :  { %17 = dma.hbm_to_smem %s255_s0, 16, %s202_s9, [#allocation5]  }
   0x4   :  { %s23_s13 = sshll.u32 %s203_s12, 4  ;;  %s24_s13 = int_to_ptr.vmem [resolvable:$true] %s23_s13 }
   0x5   :  { %s164_s14 = scalar_lea.vmem %s24_s13, 2304  ;;  %p169_p1 = scmp.lt.s32.totalorder %s24_s13, %s24_s13 }
   0x6   :  { %p165_p0 = scmp.ne.s32.totalorder %s24_s13, %s164_s14  ;;  %p170_p2 = scmp.lt.s32.totalorder %s164_s14, %s164_s14 }
   0x8   :  { %p171_p3 = por %p170_p2, %p169_p1 }
   0xa   :  { %p172_p4 = pnand %p171_p3, %p165_p0 }
   0xc   :  { %175 = shalt.err (!%p172_p4)
}
   0xd   :  { %s204_s15 = smov 128   ;;  %s205_s16 = smov 8  }
   0xe   :  { %29 = dma.hbm_to_vmem [thread:$0]  %s256_s1, 2304, %s24_s13, [#allocation3], %s204_s15, %s204_s15, %s205_s16  }
   0xf   :  { %196 = dma.done.wait [#allocation5], 16  }
  0x10   :  { %197 = vsyncadd [#allocation5], 4294967280 }
  0x11   :  { %198 = dma.done.wait [#allocation3], 2304  }
  0x12   :  { %199 = vsyncadd [#allocation3], 4294964992 }
  0x13   :  { %36 = sfence }
  0x14   :  { %s37_s0 = sld [smem:[#allocation2]]  ;;  %v38_v0 = vld [vmem:[#allocation6] sm:$0xff]  ;;  %v39_v1 = vld [vmem:[#allocation6 + $0x8] sm:$0xff]  ;;  %v45_v2 = vld [vmem:[#allocation6 + $0x10] sm:$0xff]  ;;  %s206_s26 = smov [#allocation7]  }
  0x15   :  { %s135_s19 = sld [smem:[#allocation2 + $0x1]]  ;;  %v46_v3 = vld [vmem:[#allocation6 + $0x18] sm:$0xff]  ;;  %v54_v5 = vld [vmem:[#allocation6 + $0x20] sm:$0xff]  ;;  %v55_v6 = vld [vmem:[#allocation6 + $0x28] sm:$0xff]  ;;  %s122_s27 = sshll.u32 %s206_s26, 4  ;;  %s123_s27 = int_to_ptr.vmem [resolvable:$true] %s122_s27 }
  0x16   :  { %s136_s20 = sld [smem:[#allocation2 + $0x2]]  ;;  %v63_v9 = vld [vmem:[#allocation6 + $0x30] sm:$0xff]  ;;  %v64_v14 = vld [vmem:[#allocation6 + $0x38] sm:$0xff]  ;;  %v72_v17 = vld [vmem:[#allocation6 + $0x40] sm:$0xff]  ;;  %s176_s28 = scalar_lea.vmem %s123_s27, 256 }
  0x17   :  { %s231_s21 = sld [smem:[#allocation2 + $0x3]]  ;;  %v73_v19 = vld [vmem:[#allocation6 + $0x48] sm:$0xff]  ;;  %v81_v24 = vld [vmem:[#allocation6 + $0x50] sm:$0xff]  ;;  %v82_v27 = vld [vmem:[#allocation6 + $0x58] sm:$0xff]  ;;  %p177_p5 = scmp.ne.s32.totalorder %s123_s27, %s176_s28 }
  0x18   :  { %s233_s22 = sld [smem:[#allocation2 + $0x4]]  ;;  %v90_v32 = vld [vmem:[#allocation6 + $0x60] sm:$0xff]  ;;  %v91_v34 = vld [vmem:[#allocation6 + $0x68] sm:$0xff]  ;;  %v99_v39 = vld [vmem:[#allocation6 + $0x70] sm:$0xff]  ;;  %p181_p6 = scmp.lt.s32.totalorder %s123_s27, %s123_s27 }
  0x19   :  { %s235_s23 = sld [smem:[#allocation2 + $0x5]]  ;;  %v100_v41 = vld [vmem:[#allocation6 + $0x78] sm:$0xff]  ;;  %v108_v46 = vld [vmem:[#allocation6 + $0x80] sm:$0xff]  ;;  %v109_v48 = vld [vmem:[#allocation6 + $0x88] sm:$0xff]  ;;  %p182_p7 = scmp.lt.s32.totalorder %s176_s28, %s176_s28 }
  0x1a   :  { %v40_v4 = vstv %s37_s0  ;;  %s237_s1 = sld [smem:[#allocation2 + $0x6]] }
  0x1b   :  { %v41_v7 = vmul.f32 %v40_v4, %v38_v0  ;;  %v47_v8 = vstv %s135_s19  ;;  %s239_s24 = sld [smem:[#allocation2 + $0x7]]  ;;  %v42_v10 = vmul.f32 %v40_v4, %v39_v1  ;;  %p183_p8 = por %p182_p7, %p181_p6 }
  0x1c   :  { %v48_v11 = vmul.f32 %v47_v8, %v45_v2  ;;  %v56_v12 = vstv %s136_s20  ;;  %v49_v13 = vmul.f32 %v47_v8, %v46_v3  ;;  %s242_s25 = sld [smem:[#allocation2 + $0x8]] }
  0x1d   :  { %v57_v15 = vmul.f32 %v56_v12, %v54_v5  ;;  %v65_v16 = vstv %s231_s21  ;;  %v58_v18 = vmul.f32 %v56_v12, %v55_v6  ;;  %p184_p9 = pnand %p183_p8, %p177_p5 }
  0x1e   :  { %v50_v20 = vadd.f32 %v48_v11, %v41_v7  ;;  %v66_v21 = vmul.f32 %v65_v16, %v63_v9  ;;  %v74_v22 = vstv %s233_s22  ;;  %v51_v23 = vadd.f32 %v49_v13, %v42_v10 }
  0x1f   :  { %v83_v25 = vstv %s235_s23  ;;  %v67_v26 = vmul.f32 %v65_v16, %v64_v14  ;;  %v75_v29 = vmul.f32 %v74_v22, %v72_v17  ;;  %v76_v31 = vmul.f32 %v74_v22, %v73_v19 }
  0x20   :  { %v59_v28 = vadd.f32 %v57_v15, %v50_v20  ;;  %v60_v30 = vadd.f32 %v58_v18, %v51_v23  ;;  %v92_v33 = vstv %s237_s1  ;;  %v84_v36 = vmul.f32 %v83_v25, %v81_v24 }
  0x21   :  { %v85_v38 = vmul.f32 %v83_v25, %v82_v27  ;;  %v101_v40 = vstv %s239_s24  ;;  %v93_v43 = vmul.f32 %v92_v33, %v90_v32  ;;  %v94_v45 = vmul.f32 %v92_v33, %v91_v34 }
  0x22   :  { %v68_v35 = vadd.f32 %v66_v21, %v59_v28  ;;  %v69_v37 = vadd.f32 %v67_v26, %v60_v30  ;;  %v110_v47 = vstv %s242_s25  ;;  %v102_v50 = vmul.f32 %v101_v40, %v99_v39 }
  0x23   :  { %v103_v52 = vmul.f32 %v101_v40, %v100_v41  ;;  %v111_v54 = vmul.f32 %v110_v47, %v108_v46  ;;  %v112_v56 = vmul.f32 %v110_v47, %v109_v48 }
  0x24   :  { %v77_v42 = vadd.f32 %v75_v29, %v68_v35  ;;  %v78_v44 = vadd.f32 %v76_v31, %v69_v37 }
  0x26   :  { %v86_v49 = vadd.f32 %v84_v36, %v77_v42  ;;  %v87_v51 = vadd.f32 %v85_v38, %v78_v44 }
  0x28   :  { %v95_v53 = vadd.f32 %v93_v43, %v86_v49  ;;  %v96_v55 = vadd.f32 %v94_v45, %v87_v51 }
  0x2a   :  { %v104_v57 = vadd.f32 %v102_v50, %v95_v53  ;;  %v105_v58 = vadd.f32 %v103_v52, %v96_v55 }
  0x2c   :  { %v113_v59 = vadd.f32 %v111_v54, %v104_v57  ;;  %v114_v60 = vadd.f32 %v112_v56, %v105_v58 }
  0x2e   :  { %115 = vst [vmem:[#allocation7] sm:$0xff] %v113_v59  ;;  %116 = vst [vmem:[#allocation7 + $0x8] sm:$0xff] %v114_v60 }
  0x2f   :  { %187 = shalt.err (!%p184_p9)
}
  0x30   :  { %128 = dma.vmem_to_hbm [thread:$0]  %s123_s27, 256, %s257_s2, [#allocation4], %s204_s15, %s204_s15, %s205_s16  }
  0x31   :  { %200 = dma.done.wait [#allocation4], 256  }
  0x32   :  { %201 = vsyncadd [#allocation4], 4294967040 }
  0x33   :  { %132 = vsyncpa [#allocation3], 1 }
  0x34   :  { %133 = vsyncpa [#allocation4], 1 }
  0x35   :  { %134 = vsyncpa [#allocation5], 1 }

</bundles_post_ra>
